<compile_context>
chip_gen: v5e
topology: v5e:2x2
jax: 0.10.0
libtpu: 0.0.40
codegen_flags: <defaults>
</compile_context>

<pallas_src>
import jax
import jax.numpy as jnp
from jax.experimental import pallas as pl
from jax.experimental.pallas import tpu as pltpu


def physics_loss_kernel(alpha_ref, v_ref, eidx_ref, logits_ref, params_ref,
                        out_ref):
    N = v_ref.shape[1]
    E = eidx_ref.shape[0]
    P = params_ref.shape[1]

    v_row = v_ref[...]                                       # (1, N) node voltages
    src = eidx_ref[:, 0:1]                                   # (E, 1) int32
    dst = eidx_ref[:, 1:2]                                   # (E, 1) int32

    # Single signed indicator slab, built with selects (no convert + mul).
    node_ids = jax.lax.broadcasted_iota(jnp.int32, (E, N), 1)
    d = (jnp.where(node_ids == src, 1.0, 0.0)
         - jnp.where(node_ids == dst, 1.0, 0.0))             # (E, N) in {-1,0,+1}

    # Endpoint voltage difference per edge: v[src] - v[dst] (abs() discards sign).
    v_diff = jnp.sum(d * v_row, axis=1, keepdims=True)       # (E, 1)

    impedance = params_ref[:, 0:1] + params_ref[:, 1:2]      # (E, 1)
    probs = jax.nn.sigmoid(logits_ref[...])                  # (E, 1)
    flow = jnp.abs(v_diff) / (impedance + 1e-6) * probs      # (E, 1)

    # KCL: signed scatter of flow onto nodes (negated vs. reference; squared).
    node_sum = jnp.sum(d * flow, axis=0, keepdims=True)      # (1, N)
    kcl = jnp.sum(node_sum * node_sum) / N                   # scalar

    # KVL (simplified): mean over param columns of the unbiased (ddof=1)
    # variance over edges, computed directly on the (E, P) layout.
    # NOTE: degenerate for E == 1 (matches torch.var unbiased=True -> nan).
    params = params_ref[...]                                  # (E, P)
    mean_p = jnp.sum(params, axis=0, keepdims=True) / E       # (1, P)
    cent = params - mean_p
    var_p = jnp.sum(cent * cent, axis=0, keepdims=True) / (E - 1)  # (1, P)
    kvl = jnp.sum(var_p) / P                                   # scalar

    out_ref[0, 0] = alpha_ref[0] * kcl + alpha_ref[1] * kvl


def physics_loss(node_features, edge_index, edge_logits, edge_params,
                 alpha_kcl: float = 1.0, alpha_kvl: float = 1.0):
    N = node_features.shape[0]
    E = edge_index.shape[1]

    # Only tiny arrays are reshaped/transposed in the wrapper; edge_params is
    # passed through in its original (E, P) layout (no extra HBM pass).
    v_row = node_features[:, 0].reshape(1, N).astype(jnp.float32)   # (1, N)
    eidx_t = edge_index.T.astype(jnp.int32)                          # (E, 2)
    logits = edge_logits.reshape(E, 1).astype(jnp.float32)           # (E, 1)
    params = edge_params.astype(jnp.float32)                         # (E, P)
    alphas = jnp.array([alpha_kcl, alpha_kvl], dtype=jnp.float32)    # (2,) SMEM

    out = pl.pallas_call(
        physics_loss_kernel,
        out_shape=jax.ShapeDtypeStruct((1, 1), jnp.float32),
        in_specs=[
            pl.BlockSpec(memory_space=pltpu.MemorySpace.SMEM),   # alphas
            pl.BlockSpec(memory_space=pltpu.MemorySpace.VMEM),   # node voltages
            pl.BlockSpec(memory_space=pltpu.MemorySpace.VMEM),   # edge_index^T
            pl.BlockSpec(memory_space=pltpu.MemorySpace.VMEM),   # edge logits
            pl.BlockSpec(memory_space=pltpu.MemorySpace.VMEM),   # edge params
        ],
        out_specs=pl.BlockSpec(memory_space=pltpu.MemorySpace.SMEM),
    )(alphas, v_row, eidx_t, logits, params)
    return out[0, 0]


def physics_loss_ref(node_features, edge_index, edge_logits, edge_params,
                     alpha_kcl: float = 1.0, alpha_kvl: float = 1.0):
    """Pure-JAX reference matching the PyTorch semantics."""
    probs = jax.nn.sigmoid(edge_logits)
    v = node_features[:, 0]
    src, dst = edge_index[0], edge_index[1]
    imp = edge_params[:, 0] + edge_params[:, 1]
    cur = jnp.abs(v[src] - v[dst]) / (imp + 1e-6) * probs
    n = node_features.shape[0]
    node_sum = jnp.zeros((n,), jnp.float32).at[dst].add(cur).at[src].add(-cur)
    kcl = jnp.mean(node_sum ** 2)
    kvl = jnp.mean(jnp.var(edge_params, axis=0, ddof=1))
    return alpha_kcl * kcl + alpha_kvl * kvl


if __name__ == "__main__":
    key = jax.random.PRNGKey(0)
    k1, k2, k3, k4 = jax.random.split(key, 4)

    N, F, E, P = 8, 4, 16, 4
    node_features = jax.random.normal(k1, (N, F), dtype=jnp.float32)
    edge_index = jax.random.randint(k2, (2, E), 0, N, dtype=jnp.int32)
    edge_logits = jax.random.normal(k3, (E,), dtype=jnp.float32)
    edge_params = jax.random.uniform(k4, (E, P), dtype=jnp.float32,
                                     minval=0.1, maxval=2.0)

    a_kcl, a_kvl = 0.5, 2.0   # non-default weights exercise the SMEM scalar path
    loss = physics_loss(node_features, edge_index, edge_logits, edge_params,
                        alpha_kcl=a_kcl, alpha_kvl=a_kvl)
    loss = jax.block_until_ready(loss)

    ref = physics_loss_ref(node_features, edge_index, edge_logits, edge_params,
                           alpha_kcl=a_kcl, alpha_kvl=a_kvl)
    assert jnp.allclose(loss, ref, rtol=1e-5, atol=1e-5), (loss, ref)

    print("KERNEL_OK")
</pallas_src>

<mosaic_0001>
module attributes {stable_mosaic.version = 11 : i64} {
  func.func @physics_loss_kernel(%arg0: memref<2xf32, #tpu.memory_space<smem>>, %arg1: memref<1x8xf32, #tpu.memory_space<vmem>>, %arg2: memref<16x2xi32, #tpu.memory_space<vmem>>, %arg3: memref<16x1xf32, #tpu.memory_space<vmem>>, %arg4: memref<16x4xf32, #tpu.memory_space<vmem>>, %arg5: memref<1x1xf32, #tpu.memory_space<smem>>) attributes {dimension_semantics = [], scalar_prefetch = 0 : i64, scratch_operands = 0 : i64, tpu.core_type = #tpu.core_type<tc>} {
    %c0 = arith.constant 0 : index
    %c0_0 = arith.constant 0 : index
    %0 = vector.load %arg1[%c0, %c0_0] : memref<1x8xf32, #tpu.memory_space<vmem>>, vector<1x8xf32>
    %c0_1 = arith.constant 0 : index
    %c0_2 = arith.constant 0 : index
    %1 = vector.load %arg2[%c0_1, %c0_2] : memref<16x2xi32, #tpu.memory_space<vmem>>, vector<16x1xi32>
    %c0_3 = arith.constant 0 : index
    %c1 = arith.constant 1 : index
    %2 = vector.load %arg2[%c0_3, %c1] : memref<16x2xi32, #tpu.memory_space<vmem>>, vector<16x1xi32>
    %3 = tpu.iota {dimensions = array<i32: 1>} : vector<16x8xi32>
    %4 = vector.broadcast %1 : vector<16x1xi32> to vector<16x8xi32>
    %5 = arith.cmpi eq, %3, %4 : vector<16x8xi32>
    %cst = arith.constant 1.000000e+00 : f32
    %cst_4 = arith.constant 0.000000e+00 : f32
    %6 = vector.broadcast %cst : f32 to vector<16x8xf32>
    %7 = vector.broadcast %cst_4 : f32 to vector<16x8xf32>
    %8 = arith.select %5, %6, %7 : vector<16x8xi1>, vector<16x8xf32>
    %9 = vector.broadcast %2 : vector<16x1xi32> to vector<16x8xi32>
    %10 = arith.cmpi eq, %3, %9 : vector<16x8xi32>
    %cst_5 = arith.constant 1.000000e+00 : f32
    %cst_6 = arith.constant 0.000000e+00 : f32
    %11 = vector.broadcast %cst_5 : f32 to vector<16x8xf32>
    %12 = vector.broadcast %cst_6 : f32 to vector<16x8xf32>
    %13 = arith.select %10, %11, %12 : vector<16x8xi1>, vector<16x8xf32>
    %14 = arith.subf %8, %13 : vector<16x8xf32>
    %15 = vector.broadcast %0 : vector<1x8xf32> to vector<16x8xf32>
    %16 = arith.mulf %14, %15 : vector<16x8xf32>
    %cst_7 = arith.constant dense<0.000000e+00> : vector<16xf32>
    %17 = vector.multi_reduction <add>, %16, %cst_7 [1] : vector<16x8xf32> to vector<16xf32>
    %18 = vector.shape_cast %17 : vector<16xf32> to vector<16x1xf32>
    %c0_8 = arith.constant 0 : index
    %c0_9 = arith.constant 0 : index
    %19 = vector.load %arg4[%c0_8, %c0_9] : memref<16x4xf32, #tpu.memory_space<vmem>>, vector<16x1xf32>
    %c0_10 = arith.constant 0 : index
    %c1_11 = arith.constant 1 : index
    %20 = vector.load %arg4[%c0_10, %c1_11] : memref<16x4xf32, #tpu.memory_space<vmem>>, vector<16x1xf32>
    %21 = arith.addf %19, %20 : vector<16x1xf32>
    %c0_12 = arith.constant 0 : index
    %c0_13 = arith.constant 0 : index
    %22 = vector.load %arg3[%c0_12, %c0_13] : memref<16x1xf32, #tpu.memory_space<vmem>>, vector<16x1xf32>
    %23 = arith.negf %22 : vector<16x1xf32>
    %24 = math.exp %23 : vector<16x1xf32>
    %cst_14 = arith.constant 1.000000e+00 : f32
    %25 = vector.broadcast %cst_14 : f32 to vector<16x1xf32>
    %26 = arith.addf %25, %24 : vector<16x1xf32>
    %27 = arith.divf %25, %26 : vector<16x1xf32>
    %28 = math.absf %18 : vector<16x1xf32>
    %cst_15 = arith.constant 9.99999997E-7 : f32
    %29 = vector.broadcast %cst_15 : f32 to vector<16x1xf32>
    %30 = arith.addf %21, %29 : vector<16x1xf32>
    %31 = arith.divf %28, %30 : vector<16x1xf32>
    %32 = arith.mulf %31, %27 : vector<16x1xf32>
    %33 = vector.broadcast %32 : vector<16x1xf32> to vector<16x8xf32>
    %34 = arith.mulf %14, %33 : vector<16x8xf32>
    %cst_16 = arith.constant dense<0.000000e+00> : vector<8xf32>
    %35 = vector.multi_reduction <add>, %34, %cst_16 [0] : vector<16x8xf32> to vector<8xf32>
    %36 = vector.shape_cast %35 : vector<8xf32> to vector<1x8xf32>
    %37 = arith.mulf %36, %36 : vector<1x8xf32>
    %38 = vector.shape_cast %37 : vector<1x8xf32> to vector<1x1x8xf32>
    %cst_17 = arith.constant dense<0.000000e+00> : vector<1xf32>
    %39 = vector.multi_reduction <add>, %38, %cst_17 [1, 2] : vector<1x1x8xf32> to vector<1xf32>
    %40 = vector.shape_cast %39 : vector<1xf32> to vector<1x1x1xf32>
    %41 = vector.extract %40[0, 0, 0] : f32 from vector<1x1x1xf32>
    %cst_18 = arith.constant 8.000000e+00 : f32
    %42 = arith.divf %41, %cst_18 : f32
    %c0_19 = arith.constant 0 : index
    %c0_20 = arith.constant 0 : index
    %43 = vector.load %arg4[%c0_19, %c0_20] : memref<16x4xf32, #tpu.memory_space<vmem>>, vector<16x4xf32>
    %cst_21 = arith.constant dense<0.000000e+00> : vector<4xf32>
    %44 = vector.multi_reduction <add>, %43, %cst_21 [0] : vector<16x4xf32> to vector<4xf32>
    %45 = vector.shape_cast %44 : vector<4xf32> to vector<1x4xf32>
    %cst_22 = arith.constant 1.600000e+01 : f32
    %46 = vector.broadcast %cst_22 : f32 to vector<1x4xf32>
    %47 = arith.divf %45, %46 : vector<1x4xf32>
    %48 = vector.broadcast %47 : vector<1x4xf32> to vector<16x4xf32>
    %49 = arith.subf %43, %48 : vector<16x4xf32>
    %50 = arith.mulf %49, %49 : vector<16x4xf32>
    %cst_23 = arith.constant dense<0.000000e+00> : vector<4xf32>
    %51 = vector.multi_reduction <add>, %50, %cst_23 [0] : vector<16x4xf32> to vector<4xf32>
    %52 = vector.shape_cast %51 : vector<4xf32> to vector<1x4xf32>
    %cst_24 = arith.constant 1.500000e+01 : f32
    %53 = vector.broadcast %cst_24 : f32 to vector<1x4xf32>
    %54 = arith.divf %52, %53 : vector<1x4xf32>
    %55 = vector.shape_cast %54 : vector<1x4xf32> to vector<1x1x4xf32>
    %cst_25 = arith.constant dense<0.000000e+00> : vector<1xf32>
    %56 = vector.multi_reduction <add>, %55, %cst_25 [1, 2] : vector<1x1x4xf32> to vector<1xf32>
    %57 = vector.shape_cast %56 : vector<1xf32> to vector<1x1x1xf32>
    %58 = vector.extract %57[0, 0, 0] : f32 from vector<1x1x1xf32>
    %cst_26 = arith.constant 4.000000e+00 : f32
    %59 = arith.divf %58, %cst_26 : f32
    %c0_27 = arith.constant 0 : index
    %60 = memref.load %arg0[%c0_27] : memref<2xf32, #tpu.memory_space<smem>>
    %61 = arith.mulf %60, %42 : f32
    %c1_28 = arith.constant 1 : index
    %62 = memref.load %arg0[%c1_28] : memref<2xf32, #tpu.memory_space<smem>>
    %63 = arith.mulf %62, %59 : f32
    %64 = arith.addf %61, %63 : f32
    %c0_29 = arith.constant 0 : index
    %c0_30 = arith.constant 0 : index
    %65 = memref.load %arg5[%c0_29, %c0_30] : memref<1x1xf32, #tpu.memory_space<smem>>
    memref.store %64, %arg5[%c0_29, %c0_30] : memref<1x1xf32, #tpu.memory_space<smem>>
    return
  }
}

</mosaic_0001>

<bundles_post_ra>
// kernel: tpu_custom_call.1
= control target key start
LH: loop header
LB: loop body
LE: loop exit
PB: predicated region body
PF: predicated region fallthrough
CT: control target
= control target key end

     0   :  { %10 = vsyncpa [#allocation4], 0  ;;  %s472_s0 = inlined_call_operand.vmem [shape: f32[2], index: 0, kind: input, shape index: {}]   ;;  %s473_s1 = inlined_call_operand.vmem [shape: f32[1,8], index: 1, kind: input, shape index: {}]   ;;  %s474_s2 = inlined_call_operand.vmem [shape: s32[16,2], index: 2, kind: input, shape index: {}]   ;;  %s475_s3 = inlined_call_operand.vmem [shape: f32[16,1], index: 3, kind: input, shape index: {}]   ;;  %s476_s4 = inlined_call_operand.vmem [shape: f32[16,4], index: 4, kind: input, shape index: {}]   ;;  %s477_s5 = inlined_call_operand.hbm [shape: f32[1,1], index: 5, kind: output, shape index: {}]  }
   0x1   :  { %11 = vsyncpa [#allocation3], 0  ;;  %s17_s20 = sshll.u32 %s472_s0, 4  ;;  %s358_s21 = smov [#allocation2]   ;;  %s18_s20 = int_to_ptr.vmem [resolvable:$true] %s17_s20 }
   0x2   :  { %20 = dma.vmem_to_smem %s18_s20, 16, %s358_s21, [#allocation4]  }
   0x3   :  { %354 = dma.done.wait [#allocation4], 16  }
   0x4   :  { %355 = vsyncadd [#allocation4], 4294967280 }
   0x5   :  { %33 = sfence }
   0x6   :  { %v35_v0 = vld [vmem:[%s474_s2] sm:$0xff]  ;;  %v359_v1 = vmov 1   ;;  %v360_v2 = vmov 0   ;;  %v36_v3 = vld [vmem:[%s474_s2 + $0x8] sm:$0xff]  ;;  %s361_s27 = smov 127   ;;  %v37_v6 = vlaneseq  ;;  %v362_v11 = vmov 0.0  }
   0x7   :  { %307 = vset.pattern.permute.xlu1 %v359_v1  ;;  %306 = vset.pattern.permute.xlu0 %v360_v2  ;;  %v410_v4 = vld [vmem:[%s476_s4] sm:$0xff]  ;;  %v416_v5 = vld [vmem:[%s476_s4 + $0x8] sm:$0xff]  ;;  %vm66_vm2 = vcmask 64512   ;;  %s287_s8 = sld [smem:[#allocation2 + $0x1]]  ;;  %s274_s18 = sshll.u32 %s477_s5, 4  ;;  %s275_s18 = int_to_ptr.hbm [resolvable:$true] %s274_s18 }
   0x8   :  { %50 = vperm.xlu1 %307, %v35_v0   ;;  %40 = vperm.xlu0 %306, %v35_v0   ;;  %v38_v7 = vand.u32 127, %v37_v6  ;;  %v309_v10 = vld [vmem:[%s473_s1] ss:$0 sm:$0xff]  ;;  %v86_v27 = vld [vmem:[%s475_s3 + $0x8] sm:$0xff]  ;;  %s367_s21 = smov [#allocation5]  }
   0x9   :  { %308 = vset.pattern.permute.xlu2 %v360_v2  ;;  %v85_v24 = vld [vmem:[%s475_s3] sm:$0xff]  ;;  %v286_v29 = vmul.f32 -1.442695, %v86_v27  ;;  %s262_s3 = sld [smem:[#allocation2]] }
   0xa   :  { %77 = vrot.lane.b32.xlu2 %v410_v4, %s361_s27  ;;  %v285_v25 = vmul.f32 -1.442695, %v85_v24 }
   0xc   :  { %310 = vpow2.f32 %v285_v25 }
   0xd   :  { %312 = vpow2.f32 %v286_v29 }
  0x10   :  { %53 = vperm.xlu1 %307, %v36_v3   ;;  %43 = vperm.xlu0 %306, %v36_v3  }
  0x12   :  { %79 = vrot.lane.b32.xlu2 %v416_v5, %s361_s27  ;;  %v311_v30 = vpop.eup %310 }
  0x13   :  { %v93_v33 = vadd.f32 1.0, %v311_v30  ;;  %v313_v35 = vpop.eup %312  ;;  %v363_v30 = vmov 16.0  }
  0x14   :  { %v94_v37 = vadd.f32 1.0, %v313_v35 }
  0x15   :  { %vm100_vm7 = vweird.f32 %v93_v33  ;;  %v106_v53 = vand.u32 2147483648, %v93_v33  ;;  %v104_v57 = vand.u32 2147483647, %v93_v33 }
  0x16   :  { %vm115_vm15 = vweird.f32 %v94_v37 }
  0x17   :  { %v107_v62 = vor.u32 1.1754944e-38, %v106_v53  ;;  %vm105_vm12 = vcmp.eq.f32.partialorder %v104_v57, 8.507059e+37 }
  0x64   :  { %v78_v26 = vpop.permute.xlu2 %77 }
  0x65   :  { %v83_v28 = vadd.f32 %v78_v26, %v410_v4 }
  0x67   :  { %v127_v31 = vadd.f32 1e-06, %v83_v28 }
  0x69   :  { %314 = vrcp.f32 %v127_v31  ;;  %vm134_vm5 = vweird.f32 %v127_v31  ;;  %v140_v50 = vand.u32 2147483648, %v127_v31  ;;  %v138_v52 = vand.u32 2147483647, %v127_v31 }
  0x6a   :  { %316 = vrcp.f32 %v93_v33 }
  0x6b   :  { %v141_v60 = vor.u32 1.1754944e-38, %v140_v50  ;;  %vm139_vm11 = vcmp.eq.f32.partialorder %v138_v52, 8.507059e+37  ;;  %v364_v50 = vmov 15.0  }
  0x6c   :  { %v80_v32 = vpop.permute.xlu2 %79 }
  0x6d   :  { %v84_v34 = vadd.f32 %v80_v32, %v416_v5 }
  0x6f   :  { %v438_v36 = vadd.f32 1e-06, %v84_v34  ;;  %v315_v38 = vpop.eup %314 }
  0x70   :  { %v317_v39 = vpop.eup %316  ;;  %v130_v40 = vmul.f32 %v315_v38, %v127_v31  ;;  %vm135_vm6 = vweird.f32 %v315_v38 }
  0x71   :  { %318 = vrcp.f32 %v438_v36  ;;  %v96_v41 = vmul.f32 %v317_v39, %v93_v33  ;;  %vm101_vm8 = vweird.f32 %v317_v39  ;;  %vm442_vm9 = vmor %vm134_vm5, %vm135_vm6  ;;  %vm149_vm13 = vweird.f32 %v438_v36 }
  0x72   :  { %320 = vrcp.f32 %v94_v37  ;;  %v131_v42 = vsub.f32 1.0, %v130_v40  ;;  %vm446_vm10 = vmor %vm100_vm7, %vm101_vm8  ;;  %vm203_vm6 = vcmask 31744  }
  0x73   :  { %v97_v44 = vsub.f32 1.0, %v96_v41  ;;  %v204_v28 = vsel %vm203_vm6, %v410_v4, 0.0  ;;  %v205_v29 = vsel %vm203_vm6, %v416_v5, 0.0  ;;  %322 = vrcp.f32 %v363_v30 }
  0x74   :  { %v132_v47 = vmul.f32 %v315_v38, %v131_v42  ;;  %v206_v31 = vadd.f32 %v205_v29, %v204_v28  ;;  %324 = vrcp.f32 %v364_v50 }
  0x75   :  { %v98_v48 = vmul.f32 %v317_v39, %v97_v44 }
  0x76   :  { %v133_v51 = vadd.f32 %v315_v38, %v132_v47  ;;  %v207_v32 = vrot.slane %v206_v31, 4 }
  0x77   :  { %v319_v43 = vpop.eup %318  ;;  %v99_v56 = vadd.f32 %v317_v39, %v98_v48 }
  0x78   :  { %v321_v45 = vpop.eup %320  ;;  %v145_v46 = vmul.f32 %v319_v43, %v438_v36  ;;  %v137_v61 = vsel %vm442_vm9, %v315_v38, %v133_v51  ;;  %vm150_vm14 = vweird.f32 %v319_v43  ;;  %v208_v34 = vadd.f32 %v207_v32, %v206_v31 }
  0x79   :  { %v111_v49 = vmul.f32 %v321_v45, %v94_v37  ;;  %v103_v0 = vsel %vm446_vm10, %v317_v39, %v99_v56  ;;  %v142_v3 = vsel %vm139_vm11, %v141_v60, %v137_v61  ;;  %v323_v33 = vpop.eup %322  ;;  %vm242_vm9 = vcmask 24576  }
  0x7a   :  { %v51_v8 = vpop.permute.xlu1 %50  ;;  %v41_v9 = vpop.permute.xlu0 %40  ;;  %v146_v54 = vsub.f32 1.0, %v145_v46  ;;  %v214_v35 = vmul.f32 16.0, %v323_v33  ;;  %vm218_vm7 = vweird.f32 %v323_v33  ;;  %vm183_vm10 = vcmask 57344  }
  0x7b   :  { %vm55_vm0 = vcmp.eq.s32.totalorder %v38_v7, %v51_v8  ;;  %vm45_vm1 = vcmp.eq.s32.totalorder %v38_v7, %v41_v9  ;;  %v112_v58 = vsub.f32 1.0, %v111_v49  ;;  %v121_v8 = vand.u32 2147483648, %v94_v37 }
  0x7c   :  { %v57_v12 = vsel %vm55_vm0, 1.0, %v362_v11  ;;  %v47_v13 = vsel %vm45_vm1, 1.0, %v362_v11  ;;  %v147_v63 = vmul.f32 %v319_v43, %v146_v54  ;;  %vm116_vm0 = vweird.f32 %v321_v45  ;;  %vm151_vm1 = vmor %vm149_vm13, %vm150_vm14  ;;  %v325_v54 = vpop.eup %324 }
  0x7d   :  { %v422_v14 = vsub.f32 %v47_v13, %v57_v12  ;;  %v113_v1 = vmul.f32 %v321_v45, %v112_v58  ;;  %v119_v13 = vand.u32 2147483647, %v94_v37  ;;  %v215_v37 = vsub.f32 1.0, %v214_v35 }
  0x7e   :  { %v148_v9 = vadd.f32 %v319_v43, %v147_v63  ;;  %v235_v56 = vmul.f32 15.0, %v325_v54  ;;  %vm239_vm8 = vweird.f32 %v325_v54 }
  0x7f   :  { %v64_v15 = vmul.f32 %v309_v10, %v422_v14  ;;  %v114_v12 = vadd.f32 %v321_v45, %v113_v1  ;;  %v216_v39 = vmul.f32 %v323_v33, %v215_v37 }
  0x80   :  { %v236_v58 = vsub.f32 1.0, %v235_v56 }
  0x81   :  { %v67_v16 = vsel %vm66_vm2, %v64_v15, 0.0  ;;  %v153_v15 = vand.u32 2147483647, %v438_v36  ;;  %v217_v41 = vadd.f32 %v323_v33, %v216_v39 }
  0x82   :  { %v54_v17 = vpop.permute.xlu1 %53  ;;  %v44_v18 = vpop.permute.xlu0 %43  ;;  %68 = vadd.xlane.f32.xlu0 %v67_v16  ;;  %v237_v60 = vmul.f32 %v325_v54, %v236_v58 }
  0x83   :  { %vm56_vm3 = vcmp.eq.s32.totalorder %v38_v7, %v54_v17  ;;  %vm46_vm4 = vcmp.eq.s32.totalorder %v38_v7, %v44_v18  ;;  %v108_v7 = vsel %vm105_vm12, %v107_v62, %v103_v0  ;;  %v122_v17 = vor.u32 1.1754944e-38, %v121_v8 }
  0x84   :  { %v58_v19 = vsel %vm56_vm3, 1.0, %v362_v11  ;;  %v48_v20 = vsel %vm46_vm4, 1.0, %v362_v11  ;;  %vm117_vm3 = vmor %vm115_vm15, %vm116_vm0  ;;  %vm120_vm4 = vcmp.eq.f32.partialorder %v119_v13, 8.507059e+37  ;;  %vm154_vm5 = vcmp.eq.f32.partialorder %v153_v15, 8.507059e+37 }
  0x85   :  { %v426_v21 = vsub.f32 %v48_v20, %v58_v19  ;;  %v118_v19 = vsel %vm117_vm3, %v321_v45, %v114_v12  ;;  %v152_v20 = vsel %vm151_vm1, %v319_v43, %v148_v9  ;;  %v219_v43 = vsel %vm218_vm7, %v323_v33, %v217_v41 }
  0x86   :  { %v123_v24 = vsel %vm120_vm4, %v122_v17, %v118_v19  ;;  %v365_v19 = vmov 8.0  }
  0x87   :  { %v65_v22 = vmul.f32 %v309_v10, %v426_v21  ;;  %v155_v10 = vand.u32 2147483648, %v438_v36  ;;  %v209_v36 = vrot.slane %v208_v34, 2  ;;  %326 = vrcp.f32 %v365_v19 }
  0x89   :  { %v70_v23 = vsel %vm66_vm2, %v65_v22, 0.0  ;;  %v156_v18 = vor.u32 1.1754944e-38, %v155_v10  ;;  %v210_v38 = vadd.f32 %v209_v36, %v208_v34 }
  0x8a   :  { %71 = vadd.xlane.f32.xlu1 %v70_v23 }
  0x8b   :  { %v157_v25 = vsel %vm154_vm5, %v156_v18, %v152_v20  ;;  %v211_v40 = vrot.slane %v210_v38, 1 }
  0x8d   :  { %v212_v42 = vadd.f32 %v211_v40, %v210_v38  ;;  %v327_v20 = vpop.eup %326 }
  0x8f   :  { %v220_v44 = vmul.f32 %v219_v43, %v212_v42 }
  0x91   :  { %v222_v45 = vsub.f32 %v416_v5, %v220_v44  ;;  %v221_v46 = vsub.f32 %v410_v4, %v220_v44  ;;  %v238_v4 = vadd.f32 %v325_v54, %v237_v60 }
  0x93   :  { %v224_v47 = vmul.f32 %v222_v45, %v222_v45  ;;  %v223_v48 = vmul.f32 %v221_v46, %v221_v46  ;;  %v240_v62 = vsel %vm239_vm8, %v325_v54, %v238_v4 }
  0x95   :  { %v226_v49 = vsel %vm203_vm6, %v224_v47, 0.0  ;;  %v225_v51 = vsel %vm203_vm6, %v223_v48, 0.0 }
  0x96   :  { %v227_v52 = vadd.f32 %v226_v49, %v225_v51 }
  0x98   :  { %v228_v53 = vrot.slane %v227_v52, 4 }
  0x9a   :  { %v229_v55 = vadd.f32 %v228_v53, %v227_v52 }
  0x9c   :  { %v230_v57 = vrot.slane %v229_v55, 2 }
  0x9e   :  { %v231_v59 = vadd.f32 %v230_v57, %v229_v55 }
  0xa0   :  { %v232_v5 = vrot.slane %v231_v59, 1 }
  0xa2   :  { %v233_v61 = vadd.f32 %v232_v5, %v231_v59 }
  0xa4   :  { %v241_v63 = vmul.f32 %v240_v62, %v233_v61 }
  0xa6   :  { %v243_v0 = vsel %vm242_vm9, %v241_v63, 0.0 }
  0xa7   :  { %244 = vadd.xlane.f32.xlu0 %v243_v0 }
  0xf5   :  { %v69_v2 = vpop.xlane.xlu0 %68 }
  0xf6   :  { %v125_v6 = vand.u32 2147483647, %v69_v2 }
  0xf8   :  { %v143_v11 = vmul.f32 %v142_v3, %v125_v6 }
  0xfa   :  { %v159_v16 = vmul.f32 %v143_v11, %v108_v7 }
  0xfc   :  { %163 = vperm.xlu2 %308, %v159_v16  }
  0xfd   :  { %v72_v22 = vpop.xlane.xlu1 %71 }
  0xfe   :  { %v126_v23 = vand.u32 2147483647, %v72_v22 }
 0x100   :  { %v158_v26 = vmul.f32 %v157_v25, %v126_v23 }
 0x102   :  { %v160_v27 = vmul.f32 %v158_v26, %v123_v24  ;;  %v195_v24 = vmul.f32 8.0, %v327_v20 }
 0x104   :  { %168 = vperm.xlu2 %308, %v160_v27   ;;  %v196_v27 = vsub.f32 1.0, %v195_v24 }
 0x106   :  { %v197_v33 = vmul.f32 %v327_v20, %v196_v27 }
 0x108   :  { %v198_v38 = vadd.f32 %v327_v20, %v197_v33 }
 0x156   :  { %v164_v1 = vpop.permute.xlu2 %163 }
 0x157   :  { %v171_v2 = vmul.f32 %v164_v1, %v422_v14  ;;  %v366_v14 = vmov 4.0  }
 0x158   :  { %328 = vrcp.f32 %v366_v14 }
 0x159   :  { %v173_v7 = vsel %vm66_vm2, %v171_v2, 0.0 }
 0x15e   :  { %v169_v3 = vpop.permute.xlu2 %168  ;;  %v329_v23 = vpop.eup %328 }
 0x15f   :  { %v172_v6 = vmul.f32 %v169_v3, %v426_v21  ;;  %v245_v21 = vpop.xlane.xlu0 %244  ;;  %v254_v26 = vmul.f32 4.0, %v329_v23  ;;  %vm258_vm11 = vweird.f32 %v329_v23 }
 0x160   :  { %v246_v22 = vrot.slane %v245_v21, 4 }
 0x161   :  { %v174_v8 = vsel %vm66_vm2, %v172_v6, 0.0  ;;  %v255_v31 = vsub.f32 1.0, %v254_v26  ;;  %vm199_vm2 = vweird.f32 %v327_v20 }
 0x162   :  { %v175_v9 = vadd.f32 %v174_v8, %v173_v7  ;;  %v247_v25 = vadd.f32 %v246_v22, %v245_v21  ;;  %v200_v43 = vsel %vm199_vm2, %v327_v20, %v198_v38 }
 0x163   :  { %v256_v36 = vmul.f32 %v329_v23, %v255_v31 }
 0x164   :  { %v176_v10 = vrot.slane %v175_v9, 4  ;;  %v248_v29 = vrot.slane %v247_v25, 2 }
 0x165   :  { %v257_v41 = vadd.f32 %v329_v23, %v256_v36 }
 0x166   :  { %v177_v11 = vadd.f32 %v176_v10, %v175_v9  ;;  %v249_v34 = vadd.f32 %v248_v29, %v247_v25 }
 0x167   :  { %v259_v45 = vsel %vm258_vm11, %v329_v23, %v257_v41 }
 0x168   :  { %v178_v12 = vrot.slane %v177_v11, 2  ;;  %v250_v40 = vrot.slane %v249_v34, 1 }
 0x16a   :  { %v179_v13 = vadd.f32 %v178_v12, %v177_v11  ;;  %v251_v44 = vadd.f32 %v250_v40, %v249_v34 }
 0x16c   :  { %v180_v15 = vrot.slane %v179_v13, 1 }
 0x16e   :  { %v181_v16 = vadd.f32 %v180_v15, %v179_v13 }
 0x170   :  { %v182_v17 = vmul.f32 %v181_v16, %v181_v16 }
 0x172   :  { %v184_v18 = vsel %vm183_vm10, %v182_v17, 0.0 }
 0x173   :  { %185 = vadd.xlane.f32.xlu2 %v184_v18 }
 0x1e6   :  { %v186_v28 = vpop.xlane.xlu2 %185 }
 0x1e7   :  { %v187_v30 = vrot.slane %v186_v28, 4 }
 0x1e9   :  { %v188_v32 = vadd.f32 %v187_v30, %v186_v28 }
 0x1eb   :  { %v189_v35 = vrot.slane %v188_v32, 2 }
 0x1ed   :  { %v190_v37 = vadd.f32 %v189_v35, %v188_v32 }
 0x1ef   :  { %v191_v39 = vrot.slane %v190_v37, 1 }
 0x1f1   :  { %v192_v42 = vadd.f32 %v191_v39, %v190_v37 }
 0x1f3   :  { %288 = vpush %v192_v42 }
 0x1f4   :  { %290 = vpush %v200_v43 }
 0x1f5   :  { %292 = vpush %v251_v44 }
 0x1f6   :  { %294 = vpush %v259_v45 }
 0x224   :  { %s289_s9 = spop %288 }
 0x225   :  { %s291_s10 = spop %290 }
 0x226   :  { %s202_s11 = smul.f32 %s291_s10, %s289_s9  ;;  %s293_s12 = spop %292 }
 0x227   :  { %s295_s13 = spop %294 }
 0x228   :  { %s263_s14 = smul.f32 %s262_s3, %s202_s11 }
 0x229   :  { %s261_s15 = smul.f32 %s295_s13, %s293_s12 }
 0x22b   :  { %s265_s19 = smul.f32 %s287_s8, %s261_s15 }
 0x22d   :  { %s266_s20 = sadd.f32 %s265_s19, %s263_s14 }
 0x22f   :  { %268 = sst [smem:[#allocation5]] %s266_s20 }
 0x230   :  { %277 = dma.smem_to_hbm %s367_s21, 16, %s275_s18, [#allocation3]  }
 0x231   :  { %356 = dma.done.wait [#allocation3], 16  }
 0x232   :  { %357 = vsyncadd [#allocation3], 4294967280 }
 0x233   :  { %282 = sfence }
 0x234   :  { %283 = vsyncpa [#allocation3], 1 }
 0x235   :  { %284 = vsyncpa [#allocation4], 1 }

</bundles_post_ra>
